<compile_context>
chip_gen: v7x
topology: tpu7x:2x2x1
jax: 0.10.0
libtpu: 0.0.40
codegen_flags: <defaults>
</compile_context>

<pallas_src>
import functools

import jax
import jax.numpy as jnp
from jax import lax
from jax.experimental import pallas as pl
from jax.experimental.pallas import tpu as pltpu

BN_EPS = 1e-5
LANE = 128          # TPU lane width: all feature (last) dims padded to multiples of 128.
SUBLANE_BF16 = 16   # bf16 vregs pack (16, 128): pad batch rows to a multiple of 16.


def _round_up(n, m):
    return ((n + m - 1) // m) * m


def _pad2d(x, rows, cols, value=0.0):
    r, c = x.shape
    return jnp.pad(x, ((0, rows - r), (0, cols - c)), constant_values=value)


# --- one-time parameter preprocessing (hoisted out of the per-call forward) -----------

def pack_byol_params(projector_params, predictor_params):
    """Pad to lane multiples, cast weights to bf16, and stack into 2 arrays.

    Returns:
      w_stack : (4, W0, W1) bf16   [proj_w1, proj_w2, pred_w1, pred_w2]   (zero padded)
      v_stack : (6, V)      f32    [proj_gamma, proj_beta, proj_b2,
                                    pred_gamma, pred_beta, pred_b2]
                 gamma padded with 1 (identity), beta/b2 padded with 0.
      dims    : dict of python ints (true + padded feature dims) for static kernel slicing.
    """
    pw1, pg, pb, pw2, pb2 = projector_params
    qw1, qg, qb, qw2, qb2 = predictor_params

    enc_dim, hid = pw1.shape
    proj_out = pw2.shape[1]
    pred_in, hid2 = qw1.shape
    pred_out = qw2.shape[1]
    assert pred_in == proj_out and hid2 == hid

    enc_p = _round_up(enc_dim, LANE)
    hid_p = _round_up(hid, LANE)
    proj_out_p = _round_up(proj_out, LANE)
    pred_out_p = _round_up(pred_out, LANE)

    W0 = max(enc_p, hid_p, proj_out_p)          # rows of the stacked weight slab
    W1 = max(hid_p, proj_out_p, pred_out_p)     # cols of the stacked weight slab
    V = max(hid_p, proj_out_p, pred_out_p)      # cols of the stacked vector slab

    w_stack = jnp.stack([
        _pad2d(pw1, W0, W1),
        _pad2d(pw2, W0, W1),
        _pad2d(qw1, W0, W1),
        _pad2d(qw2, W0, W1),
    ]).astype(jnp.bfloat16)

    v_stack = jnp.stack([
        _pad2d(pg.reshape(1, -1), 1, V, value=1.0)[0],
        _pad2d(pb.reshape(1, -1), 1, V)[0],
        _pad2d(pb2.reshape(1, -1), 1, V)[0],
        _pad2d(qg.reshape(1, -1), 1, V, value=1.0)[0],
        _pad2d(qb.reshape(1, -1), 1, V)[0],
        _pad2d(qb2.reshape(1, -1), 1, V)[0],
    ]).astype(jnp.float32)

    dims = dict(enc_dim=enc_dim, hid=hid, proj_out=proj_out, pred_out=pred_out,
                enc_p=enc_p, hid_p=hid_p, proj_out_p=proj_out_p, pred_out_p=pred_out_p,
                W0=W0, W1=W1, V=V)
    return w_stack, v_stack, dims


# --- kernel ----------------------------------------------------------------------------

def _bn_relu(h, gamma, beta, row_mask, inv_b):
    """BatchNorm1d (training-mode batch stats over the REAL batch rows) + ReLU, in f32.

    Padded batch rows of `h` are exactly zero, so the per-feature sum needs no mask;
    the centered values of padded rows are -mean, so they are masked out of the sumsq.
    """
    mean = jnp.sum(h, axis=0, keepdims=True) * inv_b
    hc = h - mean
    hc_m = jnp.where(row_mask, hc, 0.0)
    var = jnp.sum(hc_m * hc_m, axis=0, keepdims=True) * inv_b     # biased variance
    return jnp.maximum(hc * lax.rsqrt(var + BN_EPS) * gamma + beta, 0.0)


def byol_fused_kernel(x_ref, w_ref, v_ref, z_ref, h_ref, *,
                      enc_p, hid_p, proj_out_p, pred_out_p, b_real):
    b_pad = x_ref.shape[0]
    inv_b = 1.0 / b_real
    row_mask = lax.broadcasted_iota(jnp.int32, (b_pad, 1), 0) < b_real

    x = x_ref[...]                                  # (b_pad, enc_p) bf16, padded rows zero

    # --- projector MLP: Linear(no bias) -> BN(train) -> ReLU -> Linear(+bias) ---------
    h1 = jnp.dot(x, w_ref[0, 0:enc_p, 0:hid_p], preferred_element_type=jnp.float32)
    a1 = _bn_relu(h1, v_ref[0:1, 0:hid_p], v_ref[1:2, 0:hid_p], row_mask, inv_b)
    z = jnp.dot(a1.astype(jnp.bfloat16), w_ref[1, 0:hid_p, 0:proj_out_p],
                preferred_element_type=jnp.float32) + v_ref[2:3, 0:proj_out_p]
    z = jnp.where(row_mask, z, 0.0)                 # keep padded batch rows exactly zero
    z_ref[...] = z.astype(z_ref.dtype)

    # --- predictor MLP, consuming z straight from vregs (no HBM round-trip) -----------
    h2 = jnp.dot(z.astype(jnp.bfloat16), w_ref[2, 0:proj_out_p, 0:hid_p],
                 preferred_element_type=jnp.float32)
    a2 = _bn_relu(h2, v_ref[3:4, 0:hid_p], v_ref[4:5, 0:hid_p], row_mask, inv_b)
    h = jnp.dot(a2.astype(jnp.bfloat16), w_ref[3, 0:hid_p, 0:pred_out_p],
                preferred_element_type=jnp.float32) + v_ref[5:6, 0:pred_out_p]
    h_ref[...] = jnp.where(row_mask, h, 0.0).astype(h_ref.dtype)


# --- forward builder (static dims baked in; per-call path only pads x) ------------------

def make_byol_forward(dims, b_real):
    enc_dim, enc_p = dims["enc_dim"], dims["enc_p"]
    hid_p = dims["hid_p"]
    proj_out, proj_out_p = dims["proj_out"], dims["proj_out_p"]
    pred_out, pred_out_p = dims["pred_out"], dims["pred_out_p"]
    W0, W1, V = dims["W0"], dims["W1"], dims["V"]

    b_pad = _round_up(max(b_real, 1), SUBLANE_BF16)

    kernel = functools.partial(
        byol_fused_kernel,
        enc_p=enc_p, hid_p=hid_p, proj_out_p=proj_out_p, pred_out_p=pred_out_p,
        b_real=b_real)

    flops = 2 * b_pad * (enc_p * hid_p + hid_p * proj_out_p
                         + proj_out_p * hid_p + hid_p * pred_out_p)
    bytes_accessed = (b_pad * enc_p * 2            # x (bf16)
                      + 4 * W0 * W1 * 2            # weight stack (bf16)
                      + 6 * V * 4                  # vector stack (f32)
                      + b_pad * (proj_out_p + pred_out_p) * 2)   # bf16 outputs
    cost = pl.CostEstimate(flops=flops, transcendentals=2 * hid_p,
                           bytes_accessed=bytes_accessed)

    vmem = pl.BlockSpec(memory_space=pltpu.MemorySpace.VMEM)
    call = pl.pallas_call(
        kernel,
        out_shape=(jax.ShapeDtypeStruct((b_pad, proj_out_p), jnp.bfloat16),
                   jax.ShapeDtypeStruct((b_pad, pred_out_p), jnp.bfloat16)),
        in_specs=[vmem, vmem, vmem],
        out_specs=(vmem, vmem),
        cost_estimate=cost,
    )

    @jax.jit
    def forward(x, w_stack, v_stack):
        # TODO(synk): encoder is an injected nn.Module in the original code; identity
        #             is used here, so x plays the role of the (B, encoder_out_dim) features.
        y = x
        x_p = jnp.pad(x, ((0, b_pad - b_real), (0, enc_p - enc_dim))).astype(jnp.bfloat16)
        z_p, h_p = call(x_p, w_stack, v_stack)
        z = z_p[:b_real, :proj_out].astype(jnp.float32)
        h = h_p[:b_real, :pred_out].astype(jnp.float32)
        return y, z, h

    return forward


# --- synthetic params / references ------------------------------------------------------

def init_mlp_params(key, input_dim, hidden_size, output_dim):
    k1, k2, k3 = jax.random.split(key, 3)
    w1 = jax.random.normal(k1, (input_dim, hidden_size), jnp.float32) * (1.0 / jnp.sqrt(input_dim))
    gamma = jnp.ones((1, hidden_size), jnp.float32)     # BatchNorm1d weight init
    beta = jnp.zeros((1, hidden_size), jnp.float32)     # BatchNorm1d bias init
    w2 = jax.random.normal(k2, (hidden_size, output_dim), jnp.float32) * (1.0 / jnp.sqrt(hidden_size))
    b2 = jax.random.normal(k3, (1, output_dim), jnp.float32) * 0.01
    return (w1, gamma, beta, w2, b2)


def _mlp_ref_f32(x, w1, gamma, beta, w2, b2):
    h = x @ w1
    mean = jnp.mean(h, axis=0, keepdims=True)
    hc = h - mean
    var = jnp.mean(hc * hc, axis=0, keepdims=True)
    a = jnp.maximum(hc * lax.rsqrt(var + BN_EPS) * gamma + beta, 0.0)
    return a @ w2 + b2


def _mlp_ref_bf16(x, w1, gamma, beta, w2, b2):
    # Same math, matmul operands rounded to bf16 with f32 accumulation (mirrors the MXU path).
    h = jnp.dot(x.astype(jnp.bfloat16), w1.astype(jnp.bfloat16),
                preferred_element_type=jnp.float32)
    mean = jnp.mean(h, axis=0, keepdims=True)
    hc = h - mean
    var = jnp.mean(hc * hc, axis=0, keepdims=True)
    a = jnp.maximum(hc * lax.rsqrt(var + BN_EPS) * gamma + beta, 0.0)
    return jnp.dot(a.astype(jnp.bfloat16), w2.astype(jnp.bfloat16),
                   preferred_element_type=jnp.float32) + b2


if __name__ == "__main__":
    # Small, module-consistent shapes:
    #   encoder_out_dim=32, projector_hidden_size=64, projector_out_dim=16, batch=8
    B, ENC_DIM, HID, OUT = 8, 32, 64, 16

    key = jax.random.PRNGKey(0)
    kx, kproj, kpred = jax.random.split(key, 3)

    x = jax.random.normal(kx, (B, ENC_DIM), jnp.float32)
    projector_params = init_mlp_params(kproj, ENC_DIM, HID, OUT)
    predictor_params = init_mlp_params(kpred, OUT, HID, OUT)

    # One-time parameter preprocessing (padding + bf16 cast + stacking), hoisted out of
    # the per-call forward path.
    w_stack, v_stack, dims = pack_byol_params(projector_params, predictor_params)
    forward = make_byol_forward(dims, b_real=B)

    y, z, h = forward(x, w_stack, v_stack)
    jax.block_until_ready((y, z, h))

    # Tight check vs. a reference matching the kernel's matmul precision (bf16 operands,
    # f32 accumulation); the only extra delta is the final bf16 output store rounding.
    z_bf = _mlp_ref_bf16(x, *projector_params)
    h_bf = _mlp_ref_bf16(z_bf, *predictor_params)
    assert jnp.allclose(z, z_bf, atol=3e-2, rtol=3e-2)
    assert jnp.allclose(h, h_bf, atol=3e-2, rtol=3e-2)

    # Loose sanity bound vs. pure-f32 module semantics (difference is purely the
    # deliberate bf16 MXU-operand / output rounding).
    z_f32 = _mlp_ref_f32(x, *projector_params)
    h_f32 = _mlp_ref_f32(z_f32, *predictor_params)
    assert jnp.allclose(z, z_f32, atol=2e-1, rtol=2e-1)
    assert jnp.allclose(h, h_f32, atol=2e-1, rtol=2e-1)

    assert y.shape == (B, ENC_DIM) and z.shape == (B, OUT) and h.shape == (B, OUT)

    print("KERNEL_OK")
</pallas_src>

<mosaic_0001>
module attributes {stable_mosaic.version = 11 : i64} {
  func.func @byol_fused_kernel(%arg0: memref<16x128xbf16, #tpu.memory_space<vmem>>, %arg1: memref<4x128x128xbf16, #tpu.memory_space<vmem>>, %arg2: memref<6x128xf32, #tpu.memory_space<vmem>>, %arg3: memref<16x128xbf16, #tpu.memory_space<vmem>>, %arg4: memref<16x128xbf16, #tpu.memory_space<vmem>>) attributes {dimension_semantics = [], scalar_prefetch = 0 : i64, scratch_operands = 0 : i64, tpu.core_type = #tpu.core_type<tc>} {
    %0 = tpu.iota {dimensions = array<i32: 0>} : vector<16x1xi32>
    %c8_i32 = arith.constant 8 : i32
    %1 = vector.broadcast %c8_i32 : i32 to vector<16x1xi32>
    %2 = arith.cmpi slt, %0, %1 : vector<16x1xi32>
    %c0 = arith.constant 0 : index
    %c0_0 = arith.constant 0 : index
    %3 = vector.load %arg0[%c0, %c0_0] : memref<16x128xbf16, #tpu.memory_space<vmem>>, vector<16x128xbf16>
    %c0_1 = arith.constant 0 : index
    %c0_2 = arith.constant 0 : index
    %c0_3 = arith.constant 0 : index
    %4 = vector.load %arg1[%c0_1, %c0_2, %c0_3] : memref<4x128x128xbf16, #tpu.memory_space<vmem>>, vector<1x128x128xbf16>
    %5 = vector.shape_cast %4 : vector<1x128x128xbf16> to vector<128x128xbf16>
    %cst = arith.constant dense<0.000000e+00> : vector<16x128xf32>
    %6 = tpu.matmul %3, %5, %cst {dimension_numbers = #tpu.dot_dimension_numbers<[1], [0], [0], [1], [0, 0, 1, 1], [], []>} : vector<16x128xbf16>, vector<128x128xbf16>, vector<16x128xf32> -> vector<16x128xf32>
    %c0_4 = arith.constant 0 : index
    %c0_5 = arith.constant 0 : index
    %7 = vector.load %arg2[%c0_4, %c0_5] : memref<6x128xf32, #tpu.memory_space<vmem>>, vector<1x128xf32>
    %c1 = arith.constant 1 : index
    %c0_6 = arith.constant 0 : index
    %8 = vector.load %arg2[%c1, %c0_6] : memref<6x128xf32, #tpu.memory_space<vmem>>, vector<1x128xf32>
    %cst_7 = arith.constant dense<0.000000e+00> : vector<128xf32>
    %9 = vector.multi_reduction <add>, %6, %cst_7 [0] : vector<16x128xf32> to vector<128xf32>
    %10 = vector.shape_cast %9 : vector<128xf32> to vector<1x128xf32>
    %cst_8 = arith.constant 1.250000e-01 : f32
    %11 = vector.broadcast %cst_8 : f32 to vector<1x128xf32>
    %12 = arith.mulf %10, %11 : vector<1x128xf32>
    %13 = vector.broadcast %12 : vector<1x128xf32> to vector<16x128xf32>
    %14 = arith.subf %6, %13 : vector<16x128xf32>
    %cst_9 = arith.constant 0.000000e+00 : f32
    %15 = vector.shape_cast %2 : vector<16x1xi1> to vector<16x1xi1>
    %16 = vector.broadcast %15 : vector<16x1xi1> to vector<16x128xi1>
    %17 = vector.broadcast %cst_9 : f32 to vector<16x128xf32>
    %18 = arith.select %16, %14, %17 : vector<16x128xi1>, vector<16x128xf32>
    %19 = arith.mulf %18, %18 : vector<16x128xf32>
    %cst_10 = arith.constant dense<0.000000e+00> : vector<128xf32>
    %20 = vector.multi_reduction <add>, %19, %cst_10 [0] : vector<16x128xf32> to vector<128xf32>
    %21 = vector.shape_cast %20 : vector<128xf32> to vector<1x128xf32>
    %cst_11 = arith.constant 1.250000e-01 : f32
    %22 = vector.broadcast %cst_11 : f32 to vector<1x128xf32>
    %23 = arith.mulf %21, %22 : vector<1x128xf32>
    %cst_12 = arith.constant 9.99999974E-6 : f32
    %24 = vector.broadcast %cst_12 : f32 to vector<1x128xf32>
    %25 = arith.addf %23, %24 : vector<1x128xf32>
    %26 = math.rsqrt %25 : vector<1x128xf32>
    %27 = vector.broadcast %26 : vector<1x128xf32> to vector<16x128xf32>
    %28 = arith.mulf %14, %27 : vector<16x128xf32>
    %29 = vector.broadcast %7 : vector<1x128xf32> to vector<16x128xf32>
    %30 = arith.mulf %28, %29 : vector<16x128xf32>
    %31 = vector.broadcast %8 : vector<1x128xf32> to vector<16x128xf32>
    %32 = arith.addf %30, %31 : vector<16x128xf32>
    %cst_13 = arith.constant 0.000000e+00 : f32
    %33 = vector.broadcast %cst_13 : f32 to vector<16x128xf32>
    %34 = arith.maximumf %32, %33 : vector<16x128xf32>
    %35 = arith.truncf %34 : vector<16x128xf32> to vector<16x128xbf16>
    %c1_14 = arith.constant 1 : index
    %c0_15 = arith.constant 0 : index
    %c0_16 = arith.constant 0 : index
    %36 = vector.load %arg1[%c1_14, %c0_15, %c0_16] : memref<4x128x128xbf16, #tpu.memory_space<vmem>>, vector<1x128x128xbf16>
    %37 = vector.shape_cast %36 : vector<1x128x128xbf16> to vector<128x128xbf16>
    %cst_17 = arith.constant dense<0.000000e+00> : vector<16x128xf32>
    %38 = tpu.matmul %35, %37, %cst_17 {dimension_numbers = #tpu.dot_dimension_numbers<[1], [0], [0], [1], [0, 0, 1, 1], [], []>} : vector<16x128xbf16>, vector<128x128xbf16>, vector<16x128xf32> -> vector<16x128xf32>
    %c2 = arith.constant 2 : index
    %c0_18 = arith.constant 0 : index
    %39 = vector.load %arg2[%c2, %c0_18] : memref<6x128xf32, #tpu.memory_space<vmem>>, vector<1x128xf32>
    %40 = vector.broadcast %39 : vector<1x128xf32> to vector<16x128xf32>
    %41 = arith.addf %38, %40 : vector<16x128xf32>
    %cst_19 = arith.constant 0.000000e+00 : f32
    %42 = vector.shape_cast %2 : vector<16x1xi1> to vector<16x1xi1>
    %43 = vector.broadcast %42 : vector<16x1xi1> to vector<16x128xi1>
    %44 = vector.broadcast %cst_19 : f32 to vector<16x128xf32>
    %45 = arith.select %43, %41, %44 : vector<16x128xi1>, vector<16x128xf32>
    %46 = arith.truncf %45 : vector<16x128xf32> to vector<16x128xbf16>
    %c0_20 = arith.constant 0 : index
    %c0_21 = arith.constant 0 : index
    %47 = vector.load %arg3[%c0_20, %c0_21] : memref<16x128xbf16, #tpu.memory_space<vmem>>, vector<16x128xbf16>
    tpu.vector_store %arg3[%c0_20, %c0_21], %46 {strides = array<i32>} : memref<16x128xbf16, #tpu.memory_space<vmem>>, vector<16x128xbf16>,
    %48 = arith.truncf %45 : vector<16x128xf32> to vector<16x128xbf16>
    %c2_22 = arith.constant 2 : index
    %c0_23 = arith.constant 0 : index
    %c0_24 = arith.constant 0 : index
    %49 = vector.load %arg1[%c2_22, %c0_23, %c0_24] : memref<4x128x128xbf16, #tpu.memory_space<vmem>>, vector<1x128x128xbf16>
    %50 = vector.shape_cast %49 : vector<1x128x128xbf16> to vector<128x128xbf16>
    %cst_25 = arith.constant dense<0.000000e+00> : vector<16x128xf32>
    %51 = tpu.matmul %48, %50, %cst_25 {dimension_numbers = #tpu.dot_dimension_numbers<[1], [0], [0], [1], [0, 0, 1, 1], [], []>} : vector<16x128xbf16>, vector<128x128xbf16>, vector<16x128xf32> -> vector<16x128xf32>
    %c3 = arith.constant 3 : index
    %c0_26 = arith.constant 0 : index
    %52 = vector.load %arg2[%c3, %c0_26] : memref<6x128xf32, #tpu.memory_space<vmem>>, vector<1x128xf32>
    %c4 = arith.constant 4 : index
    %c0_27 = arith.constant 0 : index
    %53 = vector.load %arg2[%c4, %c0_27] : memref<6x128xf32, #tpu.memory_space<vmem>>, vector<1x128xf32>
    %cst_28 = arith.constant dense<0.000000e+00> : vector<128xf32>
    %54 = vector.multi_reduction <add>, %51, %cst_28 [0] : vector<16x128xf32> to vector<128xf32>
    %55 = vector.shape_cast %54 : vector<128xf32> to vector<1x128xf32>
    %cst_29 = arith.constant 1.250000e-01 : f32
    %56 = vector.broadcast %cst_29 : f32 to vector<1x128xf32>
    %57 = arith.mulf %55, %56 : vector<1x128xf32>
    %58 = vector.broadcast %57 : vector<1x128xf32> to vector<16x128xf32>
    %59 = arith.subf %51, %58 : vector<16x128xf32>
    %cst_30 = arith.constant 0.000000e+00 : f32
    %60 = vector.shape_cast %2 : vector<16x1xi1> to vector<16x1xi1>
    %61 = vector.broadcast %60 : vector<16x1xi1> to vector<16x128xi1>
    %62 = vector.broadcast %cst_30 : f32 to vector<16x128xf32>
    %63 = arith.select %61, %59, %62 : vector<16x128xi1>, vector<16x128xf32>
    %64 = arith.mulf %63, %63 : vector<16x128xf32>
    %cst_31 = arith.constant dense<0.000000e+00> : vector<128xf32>
    %65 = vector.multi_reduction <add>, %64, %cst_31 [0] : vector<16x128xf32> to vector<128xf32>
    %66 = vector.shape_cast %65 : vector<128xf32> to vector<1x128xf32>
    %cst_32 = arith.constant 1.250000e-01 : f32
    %67 = vector.broadcast %cst_32 : f32 to vector<1x128xf32>
    %68 = arith.mulf %66, %67 : vector<1x128xf32>
    %cst_33 = arith.constant 9.99999974E-6 : f32
    %69 = vector.broadcast %cst_33 : f32 to vector<1x128xf32>
    %70 = arith.addf %68, %69 : vector<1x128xf32>
    %71 = math.rsqrt %70 : vector<1x128xf32>
    %72 = vector.broadcast %71 : vector<1x128xf32> to vector<16x128xf32>
    %73 = arith.mulf %59, %72 : vector<16x128xf32>
    %74 = vector.broadcast %52 : vector<1x128xf32> to vector<16x128xf32>
    %75 = arith.mulf %73, %74 : vector<16x128xf32>
    %76 = vector.broadcast %53 : vector<1x128xf32> to vector<16x128xf32>
    %77 = arith.addf %75, %76 : vector<16x128xf32>
    %cst_34 = arith.constant 0.000000e+00 : f32
    %78 = vector.broadcast %cst_34 : f32 to vector<16x128xf32>
    %79 = arith.maximumf %77, %78 : vector<16x128xf32>
    %80 = arith.truncf %79 : vector<16x128xf32> to vector<16x128xbf16>
    %c3_35 = arith.constant 3 : index
    %c0_36 = arith.constant 0 : index
    %c0_37 = arith.constant 0 : index
    %81 = vector.load %arg1[%c3_35, %c0_36, %c0_37] : memref<4x128x128xbf16, #tpu.memory_space<vmem>>, vector<1x128x128xbf16>
    %82 = vector.shape_cast %81 : vector<1x128x128xbf16> to vector<128x128xbf16>
    %cst_38 = arith.constant dense<0.000000e+00> : vector<16x128xf32>
    %83 = tpu.matmul %80, %82, %cst_38 {dimension_numbers = #tpu.dot_dimension_numbers<[1], [0], [0], [1], [0, 0, 1, 1], [], []>} : vector<16x128xbf16>, vector<128x128xbf16>, vector<16x128xf32> -> vector<16x128xf32>
    %c5 = arith.constant 5 : index
    %c0_39 = arith.constant 0 : index
    %84 = vector.load %arg2[%c5, %c0_39] : memref<6x128xf32, #tpu.memory_space<vmem>>, vector<1x128xf32>
    %85 = vector.broadcast %84 : vector<1x128xf32> to vector<16x128xf32>
    %86 = arith.addf %83, %85 : vector<16x128xf32>
    %cst_40 = arith.constant 0.000000e+00 : f32
    %87 = vector.shape_cast %2 : vector<16x1xi1> to vector<16x1xi1>
    %88 = vector.broadcast %87 : vector<16x1xi1> to vector<16x128xi1>
    %89 = vector.broadcast %cst_40 : f32 to vector<16x128xf32>
    %90 = arith.select %88, %86, %89 : vector<16x128xi1>, vector<16x128xf32>
    %91 = arith.truncf %90 : vector<16x128xf32> to vector<16x128xbf16>
    %c0_41 = arith.constant 0 : index
    %c0_42 = arith.constant 0 : index
    %92 = vector.load %arg4[%c0_41, %c0_42] : memref<16x128xbf16, #tpu.memory_space<vmem>>, vector<16x128xbf16>
    tpu.vector_store %arg4[%c0_41, %c0_42], %91 {strides = array<i32>} : memref<16x128xbf16, #tpu.memory_space<vmem>>, vector<16x128xbf16>,
    return
  }
}

</mosaic_0001>

<bundles_post_ra>
// kernel: forward.1
= control target key start
LH: loop header
LB: loop body
LE: loop exit
PB: predicated region body
PF: predicated region fallthrough
CT: control target
= control target key end

     0   :  { %10 = vsyncpa [#allocation3], 0  ;;  %s837_s15 = smov [#allocation2]   ;;  %s948_s0 = inlined_call_operand.vmem [shape: bf16[16,128], index: 0, kind: input, shape index: {}]   ;;  %s949_s1 = inlined_call_operand.hbm [shape: bf16[4,128,128], index: 1, kind: input, shape index: {}]   ;;  %s950_s2 = inlined_call_operand.vmem [shape: f32[6,128], index: 2, kind: input, shape index: {}]   ;;  %s951_s3 = inlined_call_operand.vmem [shape: bf16[16,128], index: 3, kind: output, shape index: {0}]   ;;  %s952_s4 = inlined_call_operand.vmem [shape: bf16[16,128], index: 4, kind: output, shape index: {1}]  }
   0x1   :  { %s18_s16 = sshll.u32 %s837_s15, 4  ;;  %s813_s19 = scalar_lea.hbm %s949_s1, 4096  ;;  %s19_s16 = int_to_ptr.vmem [resolvable:$true] %s18_s16 }
   0x2   :  { %p814_p0 = scmp.ne.s32.totalorder %s949_s1, %s813_s19  ;;  %p817_p1 = scmp.lt.u32.totalorder %s813_s19, %s949_s1 }
   0x4   :  { %p819_p2 = pnand %p817_p1, %p814_p0 }
   0x6   :  { %822 = shalt.err (!%p819_p2)
}
   0x7   :  { %s823_s24 = scalar_lea.vmem %s19_s16, 4096  ;;  %p828_p4 = scmp.lt.s32.totalorder %s19_s16, %s19_s16 }
   0x8   :  { %p824_p3 = scmp.ne.s32.totalorder %s19_s16, %s823_s24  ;;  %p829_p5 = scmp.lt.s32.totalorder %s823_s24, %s823_s24 }
   0xa   :  { %p830_p6 = por %p829_p5, %p828_p4 }
   0xc   :  { %p831_p7 = pnand %p830_p6, %p824_p3 }
   0xe   :  { %834 = shalt.err (!%p831_p7)
}
   0xf   :  { %s838_s25 = smov 64   ;;  %s839_s26 = smov 4  }
  0x10   :  { %24 = dma.hbm_to_vmem [thread:$0]  %s949_s1, 4096, %s19_s16, [#allocation3], %s838_s25, %s838_s25, %s839_s26  }
  0x11   :  { %835 = dma.done.wait [#allocation3], 4096  }
  0x12   :  { %836 = vsyncadd [#allocation3], 4294963200  ;;  %v840_v0 = vmov 0.0   ;;  %vm841_vm0 = vmmov 0   ;;  %v776_v1 = vld [vmem:[#allocation2] sm:$0xff]   ;;  %v777_v2 = vld [vmem:[#allocation2 + $0x8] sm:$0xff]  }
  0x13   :  { %691 = vmatprep.subr.bf16.mxu0 %v840_v0  ;;  %707 = vmatprep.mubr.msk.bf16.mxu0 %vm841_vm0, %v840_v0  ;;  %v778_v3 = vld [vmem:[#allocation2 + $0x10] sm:$0xff]   ;;  %v779_v4 = vld [vmem:[#allocation2 + $0x18] sm:$0xff]   ;;  %v780_v5 = vld [vmem:[#allocation2 + $0x20] sm:$0xff]  }
  0x14   :  { %711 = vmatprep.subr.bf16.mxu1 %v840_v0  ;;  %727 = vmatprep.mubr.msk.bf16.mxu1 %vm841_vm0, %v840_v0  ;;  %v781_v6 = vld [vmem:[#allocation2 + $0x28] sm:$0xff]   ;;  %v782_v7 = vld [vmem:[#allocation2 + $0x30] sm:$0xff]   ;;  %v783_v8 = vld [vmem:[#allocation2 + $0x38] sm:$0xff]  }
  0x15   :  { %692 = vmatpush3.bf16.msra.mxu0 %v776_v1  ;;  %v784_v9 = vld [vmem:[%s948_s0] sm:$0xff]   ;;  %v786_v11 = vld [vmem:[#allocation2 + $0x48] sm:$0xff]   ;;  %v787_v12 = vld [vmem:[#allocation2 + $0x50] sm:$0xff]  }
  0x16   :  { %693 = vmatprep.subr.bf16.mxu0 %v840_v0  ;;  %v785_v10 = vld [vmem:[#allocation2 + $0x40] sm:$0xff]   ;;  %v788_v13 = vld [vmem:[#allocation2 + $0x58] sm:$0xff]   ;;  %v790_v15 = vld [vmem:[#allocation2 + $0x68] sm:$0xff]  }
  0x17   :  { %712 = vmatpush3.bf16.msra.mxu1 %v785_v10  ;;  %v789_v14 = vld [vmem:[#allocation2 + $0x60] sm:$0xff]   ;;  %v791_v16 = vld [vmem:[#allocation2 + $0x70] sm:$0xff]   ;;  %v792_v17 = vld [vmem:[#allocation2 + $0x78] sm:$0xff]  }
  0x18   :  { %713 = vmatprep.subr.bf16.mxu1 %v840_v0  ;;  %v793_v18 = vld [vmem:[#allocation2 + $0x80] sm:$0xff]   ;;  %v794_v19 = vld [vmem:[#allocation2 + $0x88] sm:$0xff]   ;;  %v795_v20 = vld [vmem:[#allocation2 + $0x90] sm:$0xff]  }
  0x19   :  { %694 = vmatpush3.bf16.msra.mxu0 %v777_v2  ;;  %v796_v21 = vld [vmem:[#allocation2 + $0x98] sm:$0xff]   ;;  %v797_v22 = vld [vmem:[#allocation2 + $0xa0] sm:$0xff]   ;;  %v798_v23 = vld [vmem:[#allocation2 + $0xa8] sm:$0xff]  }
  0x1a   :  { %695 = vmatprep.subr.bf16.mxu0 %v840_v0  ;;  %v799_v24 = vld [vmem:[#allocation2 + $0xb0] sm:$0xff]   ;;  %v609_v49 = vld [vmem:[%s950_s2] ss:$0 sm:$0xff]  ;;  %v610_v52 = vld [vmem:[%s950_s2 + $0x1] ss:$0 sm:$0xff] }
  0x1b   :  { %714 = vmatpush3.bf16.msra.mxu1 %v786_v11  ;;  %v800_v60 = vld [vmem:[#allocation2 + $0xb8] sm:$0xff]   ;;  %v611_v61 = vld [vmem:[%s950_s2 + $0x2] ss:$0 sm:$0xff]  ;;  %v806_v10 = vld [vmem:[#allocation2 + $0xe8] sm:$0xff]  }
  0x1c   :  { %715 = vmatprep.subr.bf16.mxu1 %v840_v0  ;;  %v807_v11 = vld [vmem:[#allocation2 + $0xf0] sm:$0xff]  }
  0x1d   :  { %696 = vmatpush3.bf16.msra.mxu0 %v778_v3 }
  0x1e   :  { %697 = vmatprep.subr.bf16.mxu0 %v840_v0 }
  0x1f   :  { %716 = vmatpush3.bf16.msra.mxu1 %v787_v12  ;;  %v808_v12 = vld [vmem:[#allocation2 + $0xf8] sm:$0xff]  }
  0x20   :  { %717 = vmatprep.subr.bf16.mxu1 %v840_v0 }
  0x21   :  { %698 = vmatpush3.bf16.msra.mxu0 %v779_v4 }
  0x22   :  { %699 = vmatprep.subr.bf16.mxu0 %v840_v0 }
  0x23   :  { %718 = vmatpush3.bf16.msra.mxu1 %v788_v13 }
  0x24   :  { %719 = vmatprep.subr.bf16.mxu1 %v840_v0 }
  0x25   :  { %700 = vmatpush3.bf16.msra.mxu0 %v780_v5  ;;  %v801_v5 = vld [vmem:[#allocation2 + $0xc0] sm:$0xff]  }
  0x26   :  { %701 = vmatprep.subr.bf16.mxu0 %v840_v0 }
  0x27   :  { %720 = vmatpush3.bf16.msra.mxu1 %v789_v14 }
  0x28   :  { %721 = vmatprep.subr.bf16.mxu1 %v840_v0 }
  0x29   :  { %702 = vmatpush3.bf16.msra.mxu0 %v781_v6  ;;  %v802_v6 = vld [vmem:[#allocation2 + $0xc8] sm:$0xff]  }
  0x2a   :  { %703 = vmatprep.subr.bf16.mxu0 %v840_v0 }
  0x2b   :  { %722 = vmatpush3.bf16.msra.mxu1 %v790_v15 }
  0x2c   :  { %723 = vmatprep.subr.bf16.mxu1 %v840_v0 }
  0x2d   :  { %704 = vmatpush3.bf16.msra.mxu0 %v782_v7  ;;  %v803_v7 = vld [vmem:[#allocation2 + $0xd0] sm:$0xff]  }
  0x2e   :  { %705 = vmatprep.subr.bf16.mxu0 %v840_v0 }
  0x2f   :  { %724 = vmatpush3.bf16.msra.mxu1 %v791_v16 }
  0x30   :  { %725 = vmatprep.subr.bf16.mxu1 %v840_v0 }
  0x31   :  { %706 = vmatpush3.bf16.msra.mxu0 %v783_v8  ;;  %v804_v8 = vld [vmem:[#allocation2 + $0xd8] sm:$0xff]  }
  0x32   :  { %731 = vmatprep.subr.bf16.mxu0 %v840_v0 }
  0x33   :  { %726 = vmatpush3.bf16.msra.mxu1 %v792_v17 }
  0x34   :  { %708 = vmatmul.mubr.bf16.vlgmr.msra.gmra.mrb[0].mxu0 %v784_v9  ;;  %751 = vmatprep.subr.bf16.mxu1 %v840_v0  ;;  %v805_v9 = vld [vmem:[#allocation2 + $0xe0] sm:$0xff]  }
  0x35   :  { %747 = vmatprep.mubr.msk.bf16.mxu0 %vm841_vm0, %v840_v0  ;;  %732 = vmatpush3.bf16.msra.mxu0 %v793_v18 }
  0x36   :  { %733 = vmatprep.subr.bf16.mxu0 %v840_v0 }
  0x39   :  { %734 = vmatpush3.bf16.msra.mxu0 %v794_v19 }
  0x3a   :  { %735 = vmatprep.subr.bf16.mxu0 %v840_v0 }
  0x3d   :  { %736 = vmatpush3.bf16.msra.mxu0 %v795_v20 }
  0x3e   :  { %737 = vmatprep.subr.bf16.mxu0 %v840_v0 }
  0x41   :  { %738 = vmatpush3.bf16.msra.mxu0 %v796_v21 }
  0x42   :  { %739 = vmatprep.subr.bf16.mxu0 %v840_v0 }
  0x45   :  { %740 = vmatpush3.bf16.msra.mxu0 %v797_v22 }
  0x46   :  { %741 = vmatprep.subr.bf16.mxu0 %v840_v0 }
  0x49   :  { %742 = vmatpush3.bf16.msra.mxu0 %v798_v23 }
  0x4a   :  { %743 = vmatprep.subr.bf16.mxu0 %v840_v0 }
  0x4d   :  { %744 = vmatpush3.bf16.msra.mxu0 %v799_v24 }
  0x4e   :  { %745 = vmatprep.subr.bf16.mxu0 %v840_v0 }
  0x51   :  { %746 = vmatpush3.bf16.msra.mxu0 %v800_v60 }
 0x107   :  { %v142_v25 = vpop.f32.mrb[0].mxu0 }
 0x108   :  { %v709_v26 = vpop.f32.mrb[1].mxu0 }
 0x109   :  { %v145_v27 = vpop.f32.mrb[2].mxu0 }
 0x10a   :  { %v151_v28 = vadd.f32 %v145_v27, %v142_v25  ;;  %v710_v29 = vpop.f32.mrb[3].mxu0 }
 0x10c   :  { %v152_v30 = vrot.slane %v151_v28, 4 }
 0x10e   :  { %v153_v31 = vadd.f32 %v152_v30, %v151_v28 }
 0x110   :  { %v154_v32 = vrot.slane %v153_v31, 2 }
 0x112   :  { %v155_v33 = vadd.f32 %v154_v32, %v153_v31 }
 0x114   :  { %v156_v34 = vrot.slane %v155_v33, 1 }
 0x116   :  { %v157_v35 = vadd.f32 %v156_v34, %v155_v33 }
 0x118   :  { %v158_v36 = vmul.f32 0.125, %v157_v35 }
 0x11a   :  { %v159_v37 = vsub.f32 %v142_v25, %v158_v36  ;;  %v160_v38 = vsub.f32 %v145_v27, %v158_v36 }
 0x11c   :  { %v167_v39 = vmul.f32 %v159_v37, %v159_v37 }
 0x11e   :  { %v170_v40 = vrot.slane %v167_v39, 4 }
 0x120   :  { %v171_v41 = vadd.f32 %v170_v40, %v167_v39  ;;  %v631_v40 = vld [vmem:[%s950_s2 + $0x4] ss:$0 sm:$0xff] }
 0x122   :  { %v172_v42 = vrot.slane %v171_v41, 2 }
 0x124   :  { %v173_v43 = vadd.f32 %v172_v42, %v171_v41 }
 0x126   :  { %v174_v44 = vrot.slane %v173_v43, 1 }
 0x128   :  { %v175_v45 = vadd.f32 %v174_v44, %v173_v43 }
 0x12a   :  { %v176_v46 = vmul.f32 0.125, %v175_v45 }
 0x12c   :  { %v177_v47 = vadd.f32 1e-05, %v176_v46 }
 0x12e   :  { %809 = vrsqrt.f32 %v177_v47 }
 0x138   :  { %v810_v48 = vpop.eup %809 }
 0x139   :  { %v179_v50 = vmul.f32 %v810_v48, %v159_v37  ;;  %v180_v51 = vmul.f32 %v810_v48, %v160_v38  ;;  %v630_v37 = vld [vmem:[%s950_s2 + $0x3] ss:$0 sm:$0xff]  ;;  %v632_v48 = vld [vmem:[%s950_s2 + $0x5] ss:$0 sm:$0xff] }
 0x13b   :  { %v185_v53 = vmul.f32 %v609_v49, %v179_v50  ;;  %v186_v54 = vmul.f32 %v609_v49, %v180_v51 }
 0x13d   :  { %v191_v55 = vadd.f32 %v610_v52, %v185_v53  ;;  %v192_v56 = vadd.f32 %v610_v52, %v186_v54 }
 0x13f   :  { %v193_v57 = vmax.f32 %v191_v55, 0.0  ;;  %v194_v58 = vmax.f32 %v192_v56, 0.0 }
 0x141   :  { %v195_v59 = vpack.c.bf16 %v194_v58, %v193_v57 }
 0x143   :  { %728 = vmatmul.mubr.bf16.vlgmr.msra.gmra.mrb[0].mxu1 %v195_v59 }
 0x144   :  { %767 = vmatprep.mubr.msk.bf16.mxu1 %vm841_vm0, %v840_v0  ;;  %752 = vmatpush3.bf16.msra.mxu1 %v801_v5 }
 0x145   :  { %753 = vmatprep.subr.bf16.mxu1 %v840_v0 }
 0x148   :  { %754 = vmatpush3.bf16.msra.mxu1 %v802_v6 }
 0x149   :  { %755 = vmatprep.subr.bf16.mxu1 %v840_v0 }
 0x14c   :  { %756 = vmatpush3.bf16.msra.mxu1 %v803_v7 }
 0x14d   :  { %757 = vmatprep.subr.bf16.mxu1 %v840_v0 }
 0x150   :  { %758 = vmatpush3.bf16.msra.mxu1 %v804_v8 }
 0x151   :  { %759 = vmatprep.subr.bf16.mxu1 %v840_v0 }
 0x154   :  { %760 = vmatpush3.bf16.msra.mxu1 %v805_v9 }
 0x155   :  { %761 = vmatprep.subr.bf16.mxu1 %v840_v0 }
 0x158   :  { %762 = vmatpush3.bf16.msra.mxu1 %v806_v10 }
 0x159   :  { %763 = vmatprep.subr.bf16.mxu1 %v840_v0 }
 0x15c   :  { %764 = vmatpush3.bf16.msra.mxu1 %v807_v11 }
 0x15d   :  { %765 = vmatprep.subr.bf16.mxu1 %v840_v0 }
 0x160   :  { %766 = vmatpush3.bf16.msra.mxu1 %v808_v12 }
 0x216   :  { %v300_v62 = vpop.f32.mrb[0].mxu1 }
 0x217   :  { %v301_v63 = vadd.f32 %v611_v61, %v300_v62  ;;  %v729_v1 = vpop.f32.mrb[1].mxu1 }
 0x218   :  { %v303_v2 = vpop.f32.mrb[2].mxu1 }
 0x219   :  { %v309_v3 = vpack.c.bf16 %v840_v0, %v301_v63  ;;  %v730_v4 = vpop.f32.mrb[3].mxu1 }
 0x21b   :  { %650 = vst [vmem:[%s951_s3] sm:$0xff] %v309_v3   ;;  %748 = vmatmul.mubr.bf16.vlgmr.msra.gmra.mrb[4].mxu0 %v309_v3 }
 0x2ee   :  { %v418_v13 = vpop.f32.mrb[4].mxu0 }
 0x2ef   :  { %v749_v14 = vpop.f32.mrb[5].mxu0 }
 0x2f0   :  { %v421_v15 = vpop.f32.mrb[6].mxu0 }
 0x2f1   :  { %v427_v16 = vadd.f32 %v421_v15, %v418_v13  ;;  %v750_v17 = vpop.f32.mrb[7].mxu0 }
 0x2f3   :  { %v428_v18 = vrot.slane %v427_v16, 4 }
 0x2f5   :  { %v429_v19 = vadd.f32 %v428_v18, %v427_v16 }
 0x2f7   :  { %v430_v20 = vrot.slane %v429_v19, 2 }
 0x2f9   :  { %v431_v21 = vadd.f32 %v430_v20, %v429_v19 }
 0x2fb   :  { %v432_v22 = vrot.slane %v431_v21, 1 }
 0x2fd   :  { %v433_v23 = vadd.f32 %v432_v22, %v431_v21 }
 0x2ff   :  { %v434_v24 = vmul.f32 0.125, %v433_v23 }
 0x301   :  { %v435_v25 = vsub.f32 %v418_v13, %v434_v24  ;;  %v436_v26 = vsub.f32 %v421_v15, %v434_v24 }
 0x303   :  { %v439_v27 = vmul.f32 %v435_v25, %v435_v25 }
 0x305   :  { %v442_v28 = vrot.slane %v439_v27, 4 }
 0x307   :  { %v443_v29 = vadd.f32 %v442_v28, %v439_v27 }
 0x309   :  { %v444_v30 = vrot.slane %v443_v29, 2 }
 0x30b   :  { %v445_v31 = vadd.f32 %v444_v30, %v443_v29 }
 0x30d   :  { %v446_v32 = vrot.slane %v445_v31, 1 }
 0x30f   :  { %v447_v33 = vadd.f32 %v446_v32, %v445_v31 }
 0x311   :  { %v448_v34 = vmul.f32 0.125, %v447_v33 }
 0x313   :  { %v449_v35 = vadd.f32 1e-05, %v448_v34 }
 0x315   :  { %811 = vrsqrt.f32 %v449_v35 }
 0x31f   :  { %v812_v36 = vpop.eup %811 }
 0x320   :  { %v451_v38 = vmul.f32 %v812_v36, %v435_v25  ;;  %v452_v39 = vmul.f32 %v812_v36, %v436_v26 }
 0x322   :  { %v457_v41 = vmul.f32 %v630_v37, %v451_v38  ;;  %v458_v42 = vmul.f32 %v630_v37, %v452_v39 }
 0x324   :  { %v463_v43 = vadd.f32 %v631_v40, %v457_v41  ;;  %v464_v44 = vadd.f32 %v631_v40, %v458_v42 }
 0x326   :  { %v466_v45 = vmax.f32 %v464_v44, 0.0  ;;  %v465_v46 = vmax.f32 %v463_v43, 0.0 }
 0x328   :  { %v467_v47 = vpack.c.bf16 %v466_v45, %v465_v46 }
 0x32a   :  { %768 = vmatmul.mubr.bf16.vlgmr.msra.gmra.mrb[4].mxu1 %v467_v47 }
 0x3fd   :  { %v572_v49 = vpop.f32.mrb[4].mxu1 }
 0x3fe   :  { %v573_v50 = vadd.f32 %v632_v48, %v572_v49  ;;  %v769_v51 = vpop.f32.mrb[5].mxu1 }
 0x3ff   :  { %v575_v52 = vpop.f32.mrb[6].mxu1 }
 0x400   :  { %v653_v53 = vpack.c.bf16 %v840_v0, %v573_v50  ;;  %v770_v54 = vpop.f32.mrb[7].mxu1 }
 0x402   :  { %654 = vst [vmem:[%s952_s4] sm:$0xff] %v653_v53  }
 0x403   :  { %599 = vsyncpa [#allocation3], 1 }

</bundles_post_ra>
